<compile_context>
chip_gen: v7x
topology: tpu7x:2x2x1
jax: 0.10.0
libtpu: 0.0.40
codegen_flags: <defaults>
</compile_context>

<pallas_src>
import jax
import jax.numpy as jnp
from jax.experimental import pallas as pl
from jax.experimental.pallas import tpu as pltpu


# ---------------------------------------------------------------------------
# helpers
# ---------------------------------------------------------------------------
def _round_up(x, m):
    return ((x + m - 1) // m) * m


def _largest_div_tile(dim, cap):
    """Largest multiple-of-128 divisor of `dim` (a 128-multiple) that is <= cap."""
    if dim <= cap:
        return dim
    t = (cap // 128) * 128
    while t >= 128:
        if dim % t == 0:
            return t
        t -= 128
    return 128  # dim is a multiple of 128, so 128 always divides


# Tile caps for the tiled path.
_TM_CAP = 256
_TN_CAP = 512
_TK_CAP = 1024
# Below this total operand footprint, use the grid-less single-tile fast path.
_FAST_PATH_MAX_BYTES = 4 * 1024 * 1024


# ---------------------------------------------------------------------------
# kernels
# ---------------------------------------------------------------------------
def _linear_small_kernel(x_ref, w_ref, b_ref, o_ref):
    # Whole problem in one VMEM tile: x(B,IN) @ w(IN,OUT) + b(1,OUT).
    o_ref[...] = (
        jnp.dot(x_ref[...], w_ref[...], preferred_element_type=jnp.float32)
        + b_ref[...]
    ).astype(o_ref.dtype)


def _linear_tiled_kernel(x_ref, w_ref, b_ref, o_ref):
    # x_ref: (tm, tk), w_ref: (tk, tn), b_ref: (1, tn), o_ref: (tm, tn).
    # Output block is resident across the K axis -> accumulate directly into it.
    k = pl.program_id(2)
    part = jnp.dot(x_ref[...], w_ref[...], preferred_element_type=jnp.float32)

    @pl.when(k == 0)
    def _init():
        o_ref[...] = (part + b_ref[...]).astype(o_ref.dtype)

    @pl.when(k > 0)
    def _accum():
        o_ref[...] = o_ref[...] + part.astype(o_ref.dtype)


def _tiled_linear(x_p, w_t_p, b_p, tm, tn, tk):
    M, K = x_p.shape
    _, N = w_t_p.shape
    grid = (M // tm, N // tn, K // tk)
    flops = 2 * M * N * K
    bytes_accessed = 4 * (M * K + K * N + M * N + N)
    return pl.pallas_call(
        _linear_tiled_kernel,
        out_shape=jax.ShapeDtypeStruct((M, N), jnp.float32),
        grid_spec=pltpu.PrefetchScalarGridSpec(
            num_scalar_prefetch=0,
            grid=grid,
            in_specs=[
                pl.BlockSpec((tm, tk), lambda i, j, k: (i, k)),
                pl.BlockSpec((tk, tn), lambda i, j, k: (k, j)),
                pl.BlockSpec((1, tn), lambda i, j, k: (0, j)),
            ],
            out_specs=pl.BlockSpec((tm, tn), lambda i, j, k: (i, j)),
        ),
        compiler_params=pltpu.CompilerParams(
            dimension_semantics=("parallel", "parallel", "arbitrary"),
        ),
        cost_estimate=pl.CostEstimate(
            flops=flops, transcendentals=0, bytes_accessed=bytes_accessed
        ),
    )(x_p, w_t_p, b_p)


# ---------------------------------------------------------------------------
# module wrapper
# ---------------------------------------------------------------------------
def make_agent_forward(w, b):
    """One-time parameter prep -> jitted forward(x) for the Agent module.

    w: (output_size, input_size) PyTorch nn.Linear weight layout.
    b: (output_size,)
    """
    w = jnp.asarray(w, jnp.float32)
    b = jnp.asarray(b, jnp.float32)
    OUT, IN = w.shape
    assert b.shape == (OUT,)

    # One-time layout change: (OUT, IN) -> (IN, OUT); paid at init, never on
    # the hot path, so the kernel's contraction is a plain MXU matmul.
    w_t = w.T
    b2 = b.reshape(1, OUT)

    # Pre-padded, lane-aligned copies for the tiled path (K,N rounded to 128
    # only -- tile sizes are chosen to divide these exactly, no over-padding).
    k_pad = _round_up(IN, 128)
    n_pad = _round_up(OUT, 128)
    w_t_pad = jnp.zeros((k_pad, n_pad), jnp.float32).at[:IN, :OUT].set(w_t)
    b_pad = jnp.zeros((1, n_pad), jnp.float32).at[0, :OUT].set(b)

    @jax.jit
    def forward(x):
        x = x.astype(jnp.float32)
        B = x.shape[0]
        assert x.shape == (B, IN)

        footprint = 4 * (B * IN + IN * OUT + 2 * B * OUT + OUT)
        if footprint <= _FAST_PATH_MAX_BYTES:
            # Single-tile fast path: no padding, whole arrays as one block
            # (allowed by the "(8,128)-or-full-dim" rule), grid-less call.
            return pl.pallas_call(
                _linear_small_kernel,
                out_shape=jax.ShapeDtypeStruct((B, OUT), jnp.float32),
            )(x, w_t, b2)

        # Tiled path.  M padded to sublane 8 (and to a 256 multiple only when
        # batch exceeds the tile cap); K/N tiles divide the 128-aligned dims.
        m_pad = _round_up(B, 8)
        if m_pad > _TM_CAP:
            tm = _TM_CAP
            m_pad = _round_up(m_pad, tm)
        else:
            tm = m_pad
        tk = _largest_div_tile(k_pad, _TK_CAP)
        tn = _largest_div_tile(n_pad, _TN_CAP)
        # v7x megacore: ensure at least one "parallel" axis has >= 2 blocks so
        # both TensorCores stream disjoint halves of W.
        if (m_pad // tm == 1) and (n_pad // tn == 1) and n_pad >= 256:
            tn = _largest_div_tile(n_pad, max(n_pad // 2, 128))

        x_p = jnp.zeros((m_pad, k_pad), jnp.float32).at[:B, :IN].set(x)
        out_p = _tiled_linear(x_p, w_t_pad, b_pad, tm, tn, tk)
        return out_p[:B, :OUT]

    return forward


def agent_forward(x, w, b):
    """Convenience single-shot form (for repeated calls use make_agent_forward)."""
    return make_agent_forward(w, b)(x)


# ---------------------------------------------------------------------------
# self-test
# ---------------------------------------------------------------------------
if __name__ == "__main__":
    # Small shapes consistent with the module: Agent(input_size=32, output_size=16)
    batch, input_size, output_size = 8, 32, 16

    key = jax.random.PRNGKey(0)
    kx, kw, kb = jax.random.split(key, 3)

    x = jax.random.normal(kx, (batch, input_size), dtype=jnp.float32)
    bound = 1.0 / jnp.sqrt(jnp.float32(input_size))
    w = jax.random.uniform(kw, (output_size, input_size), jnp.float32, -bound, bound)
    b = jax.random.uniform(kb, (output_size,), jnp.float32, -bound, bound)

    fwd = make_agent_forward(w, b)
    out = fwd(x)
    jax.block_until_ready(out)

    ref = x @ w.T + b
    assert out.shape == (batch, output_size)
    assert jnp.allclose(out, ref, atol=1e-5, rtol=1e-5)

    # Larger shapes exercising the tiled (M, N, K) grid path with divisor
    # tiles (IN=640 -> tk=640, OUT=384 -> tn split for megacore).
    B2, IN2, OUT2 = 2048, 640, 384
    k2x, k2w, k2b = jax.random.split(jax.random.PRNGKey(1), 3)
    x2 = jax.random.normal(k2x, (B2, IN2), dtype=jnp.float32)
    bound2 = 1.0 / jnp.sqrt(jnp.float32(IN2))
    w2 = jax.random.uniform(k2w, (OUT2, IN2), jnp.float32, -bound2, bound2)
    b2 = jax.random.uniform(k2b, (OUT2,), jnp.float32, -bound2, bound2)

    fwd2 = make_agent_forward(w2, b2)
    out2 = fwd2(x2)
    jax.block_until_ready(out2)
    ref2 = x2 @ w2.T + b2
    assert out2.shape == (B2, OUT2)
    assert jnp.allclose(out2, ref2, atol=1e-4, rtol=1e-4)

    print("KERNEL_OK")
</pallas_src>

<mosaic_0001>
module attributes {stable_mosaic.version = 11 : i64} {
  func.func @_linear_small_kernel(%arg0: memref<8x32xf32, #tpu.memory_space<vmem>>, %arg1: memref<32x16xf32, #tpu.memory_space<vmem>>, %arg2: memref<1x16xf32, #tpu.memory_space<vmem>>, %arg3: memref<8x16xf32, #tpu.memory_space<vmem>>) attributes {dimension_semantics = [], scalar_prefetch = 0 : i64, scratch_operands = 0 : i64, tpu.core_type = #tpu.core_type<tc>} {
    %c0 = arith.constant 0 : index
    %c0_0 = arith.constant 0 : index
    %0 = vector.load %arg0[%c0, %c0_0] : memref<8x32xf32, #tpu.memory_space<vmem>>, vector<8x32xf32>
    %c0_1 = arith.constant 0 : index
    %c0_2 = arith.constant 0 : index
    %1 = vector.load %arg1[%c0_1, %c0_2] : memref<32x16xf32, #tpu.memory_space<vmem>>, vector<32x16xf32>
    %cst = arith.constant dense<0.000000e+00> : vector<8x16xf32>
    %2 = tpu.matmul %0, %1, %cst {dimension_numbers = #tpu.dot_dimension_numbers<[1], [0], [0], [1], [0, 0, 1, 1], [], []>} : vector<8x32xf32>, vector<32x16xf32>, vector<8x16xf32> -> vector<8x16xf32>
    %c0_3 = arith.constant 0 : index
    %c0_4 = arith.constant 0 : index
    %3 = vector.load %arg2[%c0_3, %c0_4] : memref<1x16xf32, #tpu.memory_space<vmem>>, vector<1x16xf32>
    %4 = vector.broadcast %3 : vector<1x16xf32> to vector<8x16xf32>
    %5 = arith.addf %2, %4 : vector<8x16xf32>
    %c0_5 = arith.constant 0 : index
    %c0_6 = arith.constant 0 : index
    %6 = vector.load %arg3[%c0_5, %c0_6] : memref<8x16xf32, #tpu.memory_space<vmem>>, vector<8x16xf32>
    tpu.vector_store %arg3[%c0_5, %c0_6], %5 {strides = array<i32>} : memref<8x16xf32, #tpu.memory_space<vmem>>, vector<8x16xf32>,
    return
  }
}

</mosaic_0001>

<bundles_post_ra>
// kernel: forward.1
= control target key start
LH: loop header
LB: loop body
LE: loop exit
PB: predicated region body
PF: predicated region fallthrough
CT: control target
= control target key end

     0   :  { %8 = vsyncpa [#allocation3], 0  ;;  %s323_s0 = inlined_call_operand.hbm [shape: f32[8,32], index: 0, kind: input, shape index: {}]   ;;  %s324_s1 = inlined_call_operand.hbm [shape: f32[32,16], index: 1, kind: input, shape index: {}]   ;;  %s325_s2 = inlined_call_operand.vmem [shape: f32[1,16], index: 2, kind: input, shape index: {}]   ;;  %s326_s3 = inlined_call_operand.hbm [shape: f32[8,16], index: 3, kind: output, shape index: {}]  }
   0x1   :  { %9 = vsyncpa [#allocation6], 0 }
   0x2   :  { %10 = vsyncpa [#allocation4], 0  ;;  %s249_s12 = smov [#allocation2]   ;;  %s250_s14 = smov [#allocation5]  }
   0x3   :  { %s17_s13 = sshll.u32 %s249_s12, 4  ;;  %s26_s15 = sshll.u32 %s250_s14, 4  ;;  %s18_s13 = int_to_ptr.vmem [resolvable:$true] %s17_s13  ;;  %s277_s15 = int_to_ptr.vmem [resolvable:$true] %s26_s15 }
   0x4   :  { %s177_s18 = scalar_lea.hbm %s323_s0, 128 }
   0x5   :  { %p178_p0 = scmp.ne.s32.totalorder %s323_s0, %s177_s18  ;;  %p181_p1 = scmp.lt.u32.totalorder %s177_s18, %s323_s0 }
   0x7   :  { %p183_p2 = pnand %p181_p1, %p178_p0 }
   0x9   :  { %186 = shalt.err (!%p183_p2)
}
   0xa   :  { %s187_s23 = scalar_lea.vmem %s18_s13, 128  ;;  %p192_p4 = scmp.lt.s32.totalorder %s18_s13, %s18_s13 }
   0xb   :  { %p188_p3 = scmp.ne.s32.totalorder %s18_s13, %s187_s23  ;;  %p193_p5 = scmp.lt.s32.totalorder %s187_s23, %s187_s23 }
   0xd   :  { %p194_p6 = por %p193_p5, %p192_p4 }
   0xf   :  { %p195_p7 = pnand %p194_p6, %p188_p3 }
  0x11   :  { %198 = shalt.err (!%p195_p7)
}
  0x12   :  { %20 = dma.hbm_to_vmem [thread:$0]  %s323_s0, 128, %s18_s13, [#allocation3]  }
  0x13   :  { %s199_s28 = scalar_lea.hbm %s324_s1, 512 }
  0x14   :  { %p200_p8 = scmp.ne.s32.totalorder %s324_s1, %s199_s28  ;;  %p203_p9 = scmp.lt.u32.totalorder %s199_s28, %s324_s1 }
  0x16   :  { %p205_p10 = pnand %p203_p9, %p200_p8 }
  0x18   :  { %208 = shalt.err (!%p205_p10)
}
  0x19   :  { %s209_s6 = scalar_lea.vmem %s277_s15, 512  ;;  %p214_p12 = scmp.lt.s32.totalorder %s277_s15, %s277_s15 }
  0x1a   :  { %p210_p11 = scmp.ne.s32.totalorder %s277_s15, %s209_s6  ;;  %p215_p13 = scmp.lt.s32.totalorder %s209_s6, %s209_s6 }
  0x1c   :  { %p216_p0 = por %p215_p13, %p214_p12 }
  0x1e   :  { %p217_p1 = pnand %p216_p0, %p210_p11 }
  0x20   :  { %220 = shalt.err (!%p217_p1)
}
  0x21   :  { %s251_s0 = smov 128   ;;  %s252_s7 = smov 8  }
  0x22   :  { %32 = dma.hbm_to_vmem [thread:$0]  %s324_s1, 512, %s277_s15, [#allocation6], %s251_s0, %s251_s0, %s252_s7  }
  0x23   :  { %243 = dma.done.wait [#allocation3], 128  }
  0x24   :  { %244 = vsyncadd [#allocation3], 4294967168 }
  0x25   :  { %245 = dma.done.wait [#allocation6], 512  }
  0x26   :  { %246 = vsyncadd [#allocation6], 4294966784  ;;  %v253_v0 = vmov 0.0|0.0   ;;  %vm254_vm0 = vmmov 0   ;;  %v255_v1 = vmov 0.0   ;;  %v42_v2 = vld [vmem:[#allocation5] sm:$0xff] }
  0x27   :  { %163 = vmatprep.subr.bf16.mxu0 %v253_v0  ;;  %160 = vmatprep.mubr.msk.f32.mxu0 %vm254_vm0, %v255_v1  ;;  %v43_v3 = vld [vmem:[#allocation5 + $0x8] sm:$0xff]  ;;  %v44_v4 = vld [vmem:[#allocation5 + $0x10] sm:$0xff]  ;;  %v45_v6 = vld [vmem:[#allocation5 + $0x18] sm:$0xff]  ;;  %vm53_vm1 = vcmask 261120   ;;  %s256_s11 = smov [#allocation7]   ;;  %vm127_vm2 = vcmask 130048  }
  0x28   :  { %v164_v5 = vpack.c.bf16 %v43_v3, %v42_v2  ;;  %v167_v7 = vpack.c.bf16 %v45_v6, %v44_v4  ;;  %v41_v8 = vld [vmem:[#allocation2] sm:$0xff]  ;;  %s135_s12 = sshll.u32 %s256_s11, 4  ;;  %s136_s12 = int_to_ptr.vmem [resolvable:$true] %s135_s12 }
  0x29   :  { %v145_v9 = vld [vmem:[%s325_s2] ss:$0 sm:$0xff]  ;;  %s221_s13 = scalar_lea.vmem %s136_s12, 128  ;;  %p226_p3 = scmp.lt.s32.totalorder %s136_s12, %s136_s12 }
  0x2a   :  { %165 = vmatpush3.bf16.msra.mxu0 %v164_v5  ;;  %p222_p2 = scmp.ne.s32.totalorder %s136_s12, %s221_s13  ;;  %p227_p4 = scmp.lt.s32.totalorder %s221_s13, %s221_s13 }
  0x2b   :  { %166 = vmatprep.subr.bf16.mxu0 %v253_v0 }
  0x2c   :  { %p228_p5 = por %p227_p4, %p226_p3 }
  0x2e   :  { %168 = vmatpush3.bf16.msra.mxu0 %v167_v7  ;;  %p229_p6 = pnand %p228_p5, %p222_p2 }
  0x31   :  { %161 = vmatmul.mubr.msk.f32.vlgmr.msra.gmra.mrb[0].mxu0 %vm53_vm1, %v41_v8 }
 0x104   :  { %v123_v10 = vpop.f32.mrb[0].mxu0 }
 0x105   :  { %v124_v11 = vadd.f32 %v145_v9, %v123_v10  ;;  %v162_v12 = vpop.f32.mrb[1].mxu0 }
 0x107   :  { %128 = vst.msk [vmem:[#allocation7] sm:$0xff] %vm127_vm2, %v124_v11 }
 0x108   :  { %232 = shalt.err (!%p229_p6)
}
 0x109   :  { %s233_s16 = scalar_lea.hbm %s326_s3, 128 }
 0x10a   :  { %p234_p7 = scmp.ne.s32.totalorder %s326_s3, %s233_s16  ;;  %p237_p8 = scmp.lt.u32.totalorder %s233_s16, %s326_s3 }
 0x10c   :  { %p239_p9 = pnand %p237_p8, %p234_p7 }
 0x10e   :  { %242 = shalt.err (!%p239_p9)
}
 0x10f   :  { %138 = dma.vmem_to_hbm [thread:$0]  %s136_s12, 128, %s326_s3, [#allocation4]  }
 0x110   :  { %247 = dma.done.wait [#allocation4], 128  }
 0x111   :  { %248 = vsyncadd [#allocation4], 4294967168 }
 0x112   :  { %142 = vsyncpa [#allocation3], 1 }
 0x113   :  { %143 = vsyncpa [#allocation6], 1 }
 0x114   :  { %144 = vsyncpa [#allocation4], 1 }

</bundles_post_ra>
